<compile_context>
chip_gen: v6e
topology: v6e:2x2x1
jax: 0.10.0
libtpu: 0.0.40
codegen_flags: <defaults>
</compile_context>

<pallas_src>
import jax
import jax.numpy as jnp
import numpy as np
from jax.experimental import pallas as pl
from jax.experimental.pallas import tpu as pltpu

# Logical (PyTorch) dims.
D_IN, D_H1, D_H2, D_OUT = 784, 200, 200, 10
# Lane-dense padded dims (multiples of 128).
D_IN_P, D_H_P, D_OUT_P = 896, 256, 128


def _round_up(a, m):
    return (a + m - 1) // m * m


def mlp_kernel(x_ref, w1_ref, b1_ref, w2_ref, b2_ref, w3_ref, b3_ref, o_ref):
    # Layer 1: (bm, 896) @ (896, 256) -> f32 acc, bias + ReLU in f32.
    h1 = jnp.dot(x_ref[...], w1_ref[...], preferred_element_type=jnp.float32)
    h1 = jnp.maximum(h1 + b1_ref[...], 0.0)
    # Layer 2: (bm, 256) @ (256, 256); cast activation to the MXU operand dtype.
    h2 = jnp.dot(h1.astype(w2_ref.dtype), w2_ref[...],
                 preferred_element_type=jnp.float32)
    h2 = jnp.maximum(h2 + b2_ref[...], 0.0)
    # Layer 3: (bm, 256) @ (256, 128); lane-dense (128-wide) output store.
    h3 = jnp.dot(h2.astype(w3_ref.dtype), w3_ref[...],
                 preferred_element_type=jnp.float32)
    o_ref[...] = jnp.maximum(h3 + b3_ref[...], 0.0).astype(o_ref.dtype)


def mlp_forward(x, w1, b1, w2, b2, w3, b3, *, block_m=512,
                compute_dtype=jnp.float32):
    """x: (B, 784) float32. Weights are the padded (in, out) arrays from
    init_params. Returns (B, 10) float32."""
    B = x.shape[0]
    # Shrink the tile for tiny batches; keep sublane multiple of 8.
    bm = min(block_m, _round_up(B, 8))
    Bp = _round_up(B, bm)
    grid = (Bp // bm,)

    # Zero-pad batch -> Bp and features 784 -> 896; cast MXU operands.
    x_p = jnp.zeros((Bp, D_IN_P), compute_dtype)
    x_p = x_p.at[:B, :D_IN].set(x.astype(compute_dtype))
    w1c = w1.astype(compute_dtype)
    w2c = w2.astype(compute_dtype)
    w3c = w3.astype(compute_dtype)

    full = lambda shape: pl.BlockSpec(shape, lambda i: (0,) * len(shape))

    bytes_per = jnp.dtype(compute_dtype).itemsize
    cost = pl.CostEstimate(
        flops=2 * B * (D_IN * D_H1 + D_H1 * D_H2 + D_H2 * D_OUT),
        transcendentals=0,
        bytes_accessed=(Bp * D_IN_P * bytes_per                      # x stream
                        + (D_IN_P * D_H_P + D_H_P * D_H_P
                           + D_H_P * D_OUT_P) * bytes_per            # weights
                        + (D_H_P + D_H_P + D_OUT_P) * 4              # biases
                        + Bp * D_OUT_P * 4),                         # output
    )

    out = pl.pallas_call(
        mlp_kernel,
        out_shape=jax.ShapeDtypeStruct((Bp, D_OUT_P), jnp.float32),
        grid=grid,
        in_specs=[
            pl.BlockSpec((bm, D_IN_P), lambda i: (i, 0)),   # x tile
            full((D_IN_P, D_H_P)),
            full((1, D_H_P)),
            full((D_H_P, D_H_P)),
            full((1, D_H_P)),
            full((D_H_P, D_OUT_P)),
            full((1, D_OUT_P)),
        ],
        out_specs=pl.BlockSpec((bm, D_OUT_P), lambda i: (i, 0)),
        compiler_params=pltpu.CompilerParams(
            dimension_semantics=("parallel",),
            vmem_limit_bytes=64 << 20,
        ),
        cost_estimate=cost,
    )(x_p, w1c, b1, w2c, b2, w3c, b3)

    # Slice away batch padding and the lane padding of the 10-wide output.
    return out[:B, :D_OUT]


def init_params(key):
    """nn.Linear-style U(-1/sqrt(fan_in), 1/sqrt(fan_in)) init, stored as
    (in, out) = transpose of torch's (out, in), zero-padded to lane-dense
    shapes. Padded rows/cols and padded bias entries are exactly zero."""
    ks = jax.random.split(key, 6)

    def linear(kw, kb, fan_in, fan_out, in_p, out_p):
        bound = 1.0 / np.sqrt(fan_in)
        w = jax.random.uniform(kw, (fan_in, fan_out), jnp.float32, -bound, bound)
        b = jax.random.uniform(kb, (1, fan_out), jnp.float32, -bound, bound)
        w_p = jnp.zeros((in_p, out_p), jnp.float32).at[:fan_in, :fan_out].set(w)
        b_p = jnp.zeros((1, out_p), jnp.float32).at[:, :fan_out].set(b)
        return w_p, b_p

    w1, b1 = linear(ks[0], ks[1], D_IN, D_H1, D_IN_P, D_H_P)
    w2, b2 = linear(ks[2], ks[3], D_H1, D_H2, D_H_P, D_H_P)
    w3, b3 = linear(ks[4], ks[5], D_H2, D_OUT, D_H_P, D_OUT_P)
    return w1, b1, w2, b2, w3, b3


if __name__ == "__main__":
    key = jax.random.PRNGKey(0)
    k_x, k_p = jax.random.split(key)

    w1, b1, w2, b2, w3, b3 = init_params(k_p)

    # Reference in plain JAX on the logical (unpadded) sub-blocks.
    def ref(x):
        h = jnp.maximum(x @ w1[:D_IN, :D_H1] + b1[:, :D_H1], 0.0)
        h = jnp.maximum(h @ w2[:D_H1, :D_H2] + b2[:, :D_H2], 0.0)
        return jnp.maximum(h @ w3[:D_H2, :D_OUT] + b3[:, :D_OUT], 0.0)

    # Small deterministic batch; f32 MXU path (exact check).
    batch = 8
    x = jax.random.normal(k_x, (batch, D_IN), jnp.float32)
    out = jax.block_until_ready(
        mlp_forward(x, w1, b1, w2, b2, w3, b3, compute_dtype=jnp.float32))
    np.testing.assert_allclose(np.asarray(out), np.asarray(ref(x)),
                               rtol=1e-5, atol=1e-5)
    assert out.shape == (batch, D_OUT)

    # Ragged batch exercising the pad-to-tile path.
    batch2 = 13
    x2 = jax.random.normal(jax.random.PRNGKey(2), (batch2, D_IN), jnp.float32)
    out2 = jax.block_until_ready(
        mlp_forward(x2, w1, b1, w2, b2, w3, b3, compute_dtype=jnp.float32))
    np.testing.assert_allclose(np.asarray(out2), np.asarray(ref(x2)),
                               rtol=1e-5, atol=1e-5)
    assert out2.shape == (batch2, D_OUT)

    # bf16 MXU operands (f32 accumulation + epilogue), looser tolerance.
    out_bf16 = jax.block_until_ready(
        mlp_forward(x, w1, b1, w2, b2, w3, b3, compute_dtype=jnp.bfloat16))
    np.testing.assert_allclose(np.asarray(out_bf16), np.asarray(ref(x)),
                               rtol=3e-2, atol=3e-2)

    # TODO(synk): the PyTorch spec applies ReLU to the final logits
    # (nn.ReLU after the last Linear); this kernel reproduces that exactly.
    print("KERNEL_OK")
</pallas_src>

<mosaic_0001>
module attributes {stable_mosaic.version = 11 : i64} {
  func.func @mlp_kernel(%arg0: i32, %arg1: memref<8x896xf32, #tpu.memory_space<vmem>>, %arg2: memref<896x256xf32, #tpu.memory_space<vmem>>, %arg3: memref<1x256xf32, #tpu.memory_space<vmem>>, %arg4: memref<256x256xf32, #tpu.memory_space<vmem>>, %arg5: memref<1x256xf32, #tpu.memory_space<vmem>>, %arg6: memref<256x128xf32, #tpu.memory_space<vmem>>, %arg7: memref<1x128xf32, #tpu.memory_space<vmem>>, %arg8: memref<8x128xf32, #tpu.memory_space<vmem>>) attributes {dimension_semantics = [#tpu.dimension_semantics<parallel>], iteration_bounds = array<i64: 1>, scalar_prefetch = 0 : i64, scratch_operands = 0 : i64, tpu.core_type = #tpu.core_type<tc>, window_params = [{transform_indices = @transform_0, window_bounds = array<i64: 8, 896>}, {pipeline_mode = #tpu.pipeline_mode<synchronous>, transform_indices = @transform_1, window_bounds = array<i64: 896, 256>}, {pipeline_mode = #tpu.pipeline_mode<synchronous>, transform_indices = @transform_2, window_bounds = array<i64: 1, 256>}, {pipeline_mode = #tpu.pipeline_mode<synchronous>, transform_indices = @transform_3, window_bounds = array<i64: 256, 256>}, {pipeline_mode = #tpu.pipeline_mode<synchronous>, transform_indices = @transform_4, window_bounds = array<i64: 1, 256>}, {pipeline_mode = #tpu.pipeline_mode<synchronous>, transform_indices = @transform_5, window_bounds = array<i64: 256, 128>}, {pipeline_mode = #tpu.pipeline_mode<synchronous>, transform_indices = @transform_6, window_bounds = array<i64: 1, 128>}, {transform_indices = @transform_7, window_bounds = array<i64: 8, 128>}]} {
    %c0 = arith.constant 0 : index
    %c0_0 = arith.constant 0 : index
    %0 = vector.load %arg1[%c0, %c0_0] : memref<8x896xf32, #tpu.memory_space<vmem>>, vector<8x896xf32>
    %c0_1 = arith.constant 0 : index
    %c0_2 = arith.constant 0 : index
    %1 = vector.load %arg2[%c0_1, %c0_2] : memref<896x256xf32, #tpu.memory_space<vmem>>, vector<896x256xf32>
    %cst = arith.constant dense<0.000000e+00> : vector<8x256xf32>
    %2 = tpu.matmul %0, %1, %cst {dimension_numbers = #tpu.dot_dimension_numbers<[1], [0], [0], [1], [0, 0, 1, 1], [], []>} : vector<8x896xf32>, vector<896x256xf32>, vector<8x256xf32> -> vector<8x256xf32>
    %c0_3 = arith.constant 0 : index
    %c0_4 = arith.constant 0 : index
    %3 = vector.load %arg3[%c0_3, %c0_4] : memref<1x256xf32, #tpu.memory_space<vmem>>, vector<1x256xf32>
    %4 = vector.broadcast %3 : vector<1x256xf32> to vector<8x256xf32>
    %5 = arith.addf %2, %4 : vector<8x256xf32>
    %cst_5 = arith.constant 0.000000e+00 : f32
    %6 = vector.broadcast %cst_5 : f32 to vector<8x256xf32>
    %7 = arith.maximumf %5, %6 : vector<8x256xf32>
    %c0_6 = arith.constant 0 : index
    %c0_7 = arith.constant 0 : index
    %8 = vector.load %arg4[%c0_6, %c0_7] : memref<256x256xf32, #tpu.memory_space<vmem>>, vector<256x256xf32>
    %cst_8 = arith.constant dense<0.000000e+00> : vector<8x256xf32>
    %9 = tpu.matmul %7, %8, %cst_8 {dimension_numbers = #tpu.dot_dimension_numbers<[1], [0], [0], [1], [0, 0, 1, 1], [], []>} : vector<8x256xf32>, vector<256x256xf32>, vector<8x256xf32> -> vector<8x256xf32>
    %c0_9 = arith.constant 0 : index
    %c0_10 = arith.constant 0 : index
    %10 = vector.load %arg5[%c0_9, %c0_10] : memref<1x256xf32, #tpu.memory_space<vmem>>, vector<1x256xf32>
    %11 = vector.broadcast %10 : vector<1x256xf32> to vector<8x256xf32>
    %12 = arith.addf %9, %11 : vector<8x256xf32>
    %cst_11 = arith.constant 0.000000e+00 : f32
    %13 = vector.broadcast %cst_11 : f32 to vector<8x256xf32>
    %14 = arith.maximumf %12, %13 : vector<8x256xf32>
    %c0_12 = arith.constant 0 : index
    %c0_13 = arith.constant 0 : index
    %15 = vector.load %arg6[%c0_12, %c0_13] : memref<256x128xf32, #tpu.memory_space<vmem>>, vector<256x128xf32>
    %cst_14 = arith.constant dense<0.000000e+00> : vector<8x128xf32>
    %16 = tpu.matmul %14, %15, %cst_14 {dimension_numbers = #tpu.dot_dimension_numbers<[1], [0], [0], [1], [0, 0, 1, 1], [], []>} : vector<8x256xf32>, vector<256x128xf32>, vector<8x128xf32> -> vector<8x128xf32>
    %c0_15 = arith.constant 0 : index
    %c0_16 = arith.constant 0 : index
    %17 = vector.load %arg7[%c0_15, %c0_16] : memref<1x128xf32, #tpu.memory_space<vmem>>, vector<1x128xf32>
    %18 = vector.broadcast %17 : vector<1x128xf32> to vector<8x128xf32>
    %19 = arith.addf %16, %18 : vector<8x128xf32>
    %cst_17 = arith.constant 0.000000e+00 : f32
    %20 = vector.broadcast %cst_17 : f32 to vector<8x128xf32>
    %21 = arith.maximumf %19, %20 : vector<8x128xf32>
    %c0_18 = arith.constant 0 : index
    %c0_19 = arith.constant 0 : index
    %22 = vector.load %arg8[%c0_18, %c0_19] : memref<8x128xf32, #tpu.memory_space<vmem>>, vector<8x128xf32>
    tpu.vector_store %arg8[%c0_18, %c0_19], %21 {strides = array<i32>} : memref<8x128xf32, #tpu.memory_space<vmem>>, vector<8x128xf32>,
    return
  }
  func.func @transform_0(%arg0: i32) -> (i32, i32) {
    %c0_i32 = arith.constant 0 : i32
    %c0_i32_0 = arith.constant 0 : i32
    return %arg0, %c0_i32 : i32, i32
  }
  func.func @transform_1(%arg0: i32) -> (i32, i32) {
    %c0_i32 = arith.constant 0 : i32
    %c0_i32_0 = arith.constant 0 : i32
    %c0_i32_1 = arith.constant 0 : i32
    return %c0_i32, %c0_i32_0 : i32, i32
  }
  func.func @transform_2(%arg0: i32) -> (i32, i32) {
    %c0_i32 = arith.constant 0 : i32
    %c0_i32_0 = arith.constant 0 : i32
    %c0_i32_1 = arith.constant 0 : i32
    return %c0_i32, %c0_i32_0 : i32, i32
  }
  func.func @transform_3(%arg0: i32) -> (i32, i32) {
    %c0_i32 = arith.constant 0 : i32
    %c0_i32_0 = arith.constant 0 : i32
    %c0_i32_1 = arith.constant 0 : i32
    return %c0_i32, %c0_i32_0 : i32, i32
  }
  func.func @transform_4(%arg0: i32) -> (i32, i32) {
    %c0_i32 = arith.constant 0 : i32
    %c0_i32_0 = arith.constant 0 : i32
    %c0_i32_1 = arith.constant 0 : i32
    return %c0_i32, %c0_i32_0 : i32, i32
  }
  func.func @transform_5(%arg0: i32) -> (i32, i32) {
    %c0_i32 = arith.constant 0 : i32
    %c0_i32_0 = arith.constant 0 : i32
    %c0_i32_1 = arith.constant 0 : i32
    return %c0_i32, %c0_i32_0 : i32, i32
  }
  func.func @transform_6(%arg0: i32) -> (i32, i32) {
    %c0_i32 = arith.constant 0 : i32
    %c0_i32_0 = arith.constant 0 : i32
    %c0_i32_1 = arith.constant 0 : i32
    return %c0_i32, %c0_i32_0 : i32, i32
  }
  func.func @transform_7(%arg0: i32) -> (i32, i32) {
    %c0_i32 = arith.constant 0 : i32
    %c0_i32_0 = arith.constant 0 : i32
    return %arg0, %c0_i32 : i32, i32
  }
}

</mosaic_0001>

<bundles_post_ra>
// kernel: tpu_custom_call.1
= control target key start
LH: loop header
LB: loop body
LE: loop exit
PB: predicated region body
PF: predicated region fallthrough
CT: control target
= control target key end

     0   :  { %12 = vsyncpa [#allocation3], 0  ;;  %s1114_s0 = inlined_call_operand.hbm [shape: f32[8,896], index: 0, kind: input, shape index: {}]   ;;  %s1115_s1 = inlined_call_operand.hbm [shape: f32[896,256], index: 1, kind: input, shape index: {}]   ;;  %s1116_s2 = inlined_call_operand.vmem [shape: f32[1,256], index: 2, kind: input, shape index: {}]   ;;  %s1117_s3 = inlined_call_operand.hbm [shape: f32[256,256], index: 3, kind: input, shape index: {}]   ;;  %s1118_s4 = inlined_call_operand.vmem [shape: f32[1,256], index: 4, kind: input, shape index: {}]   ;;  %s1119_s5 = inlined_call_operand.hbm [shape: f32[256,128], index: 5, kind: input, shape index: {}]   ;;  %s1120_s6 = inlined_call_operand.vmem [shape: f32[1,128], index: 6, kind: input, shape index: {}]   ;;  %s1121_s7 = inlined_call_operand.hbm [shape: f32[8,128], index: 7, kind: output, shape index: {}]  }
   0x1   :  { %13 = vsyncpa [#allocation6], 0 }
   0x2   :  { %14 = vsyncpa [#allocation9], 0 }
   0x3   :  { %15 = vsyncpa [#allocation4], 0  ;;  %s1040_s24 = smov [#allocation5]  }
   0x4   :  { %s31_s25 = sshll.u32 %s1040_s24, 4  ;;  %s32_s25 = int_to_ptr.vmem [resolvable:$true] %s31_s25 }
   0x5   :  { %s940_s26 = scalar_lea.vmem %s32_s25, 28672  ;;  %p945_p1 = scmp.lt.s32.totalorder %s32_s25, %s32_s25 }
   0x6   :  { %p941_p0 = scmp.ne.s32.totalorder %s32_s25, %s940_s26  ;;  %p946_p2 = scmp.lt.s32.totalorder %s940_s26, %s940_s26 }
   0x8   :  { %p947_p3 = por %p946_p2, %p945_p1 }
   0xa   :  { %p948_p4 = pnand %p947_p3, %p941_p0 }
   0xc   :  { %951 = shalt.err (!%p948_p4)
}
   0xd   :  { %s1041_s27 = smov 256   ;;  %s1042_s28 = smov 16  }
   0xe   :  { %37 = dma.hbm_to_vmem [thread:$0]  %s1115_s1, 28672, %s32_s25, [#allocation6], %s1041_s27, %s1041_s27, %s1042_s28  }
   0xf   :  { %s1043_s8 = smov [#allocation2]   ;;  %s1044_s10 = smov [#allocation7]  }
  0x10   :  { %s22_s9 = sshll.u32 %s1043_s8, 4  ;;  %s45_s11 = sshll.u32 %s1044_s10, 4  ;;  %s23_s9 = int_to_ptr.vmem [resolvable:$true] %s22_s9  ;;  %s46_s11 = int_to_ptr.vmem [resolvable:$true] %s45_s11 }
  0x11   :  { %s960_s12 = scalar_lea.vmem %s23_s9, 896  ;;  %p965_p6 = scmp.lt.s32.totalorder %s23_s9, %s23_s9 }
  0x12   :  { %p961_p5 = scmp.ne.s32.totalorder %s23_s9, %s960_s12  ;;  %p966_p7 = scmp.lt.s32.totalorder %s960_s12, %s960_s12 }
  0x14   :  { %p967_p8 = por %p966_p7, %p965_p6 }
  0x16   :  { %p968_p9 = pnand %p967_p8, %p961_p5 }
  0x18   :  { %971 = shalt.err (!%p968_p9)
}
  0x19   :  { %25 = dma.hbm_to_vmem [thread:$0]  %s1114_s0, 896, %s23_s9, [#allocation3]  }
  0x1a   :  { %s980_s15 = scalar_lea.vmem %s46_s11, 8192  ;;  %p985_p11 = scmp.lt.s32.totalorder %s46_s11, %s46_s11 }
  0x1b   :  { %p981_p10 = scmp.ne.s32.totalorder %s46_s11, %s980_s15  ;;  %p986_p12 = scmp.lt.s32.totalorder %s980_s15, %s980_s15 }
  0x1d   :  { %p987_p13 = por %p986_p12, %p985_p11 }
  0x1f   :  { %p988_p0 = pnand %p987_p13, %p981_p10 }
  0x21   :  { %991 = shalt.err (!%p988_p0)
}
  0x22   :  { %51 = dma.hbm_to_vmem [thread:$0]  %s1117_s3, 8192, %s46_s11, [#allocation6], %s1041_s27, %s1041_s27, %s1042_s28  }
  0x23   :  { %s1045_s17 = smov [#allocation8]  }
  0x24   :  { %s59_s18 = sshll.u32 %s1045_s17, 4  ;;  %s60_s18 = int_to_ptr.vmem [resolvable:$true] %s59_s18 }
  0x25   :  { %s1000_s19 = scalar_lea.vmem %s60_s18, 4096  ;;  %p1005_p2 = scmp.lt.s32.totalorder %s60_s18, %s60_s18 }
  0x26   :  { %p1001_p1 = scmp.ne.s32.totalorder %s60_s18, %s1000_s19  ;;  %p1006_p3 = scmp.lt.s32.totalorder %s1000_s19, %s1000_s19 }
  0x28   :  { %p1007_p4 = por %p1006_p3, %p1005_p2 }
  0x2a   :  { %p1008_p5 = pnand %p1007_p4, %p1001_p1 }
  0x2c   :  { %1011 = shalt.err (!%p1008_p5)
}
  0x2d   :  { %s1046_s0 = smov 128   ;;  %s1047_s20 = smov 8  }
  0x2e   :  { %65 = dma.hbm_to_vmem [thread:$0]  %s1119_s5, 4096, %s60_s18, [#allocation9], %s1046_s0, %s1046_s0, %s1047_s20  }
  0x2f   :  { %1032 = dma.done.wait [#allocation3], 896  }
  0x30   :  { %1033 = vsyncadd [#allocation3], 4294966400 }
  0x31   :  { %1034 = dma.done.wait [#allocation6], 36864  }
  0x32   :  { %1035 = vsyncadd [#allocation6], 4294930432 }
  0x33   :  { %1036 = dma.done.wait [#allocation9], 4096  }
  0x34   :  { %1037 = vsyncadd [#allocation9], 4294963200  ;;  %v118_v0 = vld [vmem:[#allocation5 + $0xf8] sm:$0xff]  ;;  %v117_v1 = vld [vmem:[#allocation5 + $0xf0] sm:$0xff]  ;;  %s1049_s26 = smov [#allocation10]  }
  0x35   :  { %v116_v2 = vld [vmem:[#allocation5 + $0xe8] sm:$0xff]  ;;  %323 = vmatprep.subr.mxu0 %v118_v0  ;;  %v182_v3 = vld [vmem:[#allocation5 + $0x2f8] sm:$0xff]  ;;  %v115_v4 = vld [vmem:[#allocation5 + $0xe0] sm:$0xff]  ;;  %s875_s27 = sshll.u32 %s1049_s26, 4  ;;  %s876_s27 = int_to_ptr.vmem [resolvable:$true] %s875_s27 }
  0x36   :  { %v181_v5 = vld [vmem:[#allocation5 + $0x2f0] sm:$0xff]  ;;  %324 = vmatpush1.msra.mxu0 %v117_v1  ;;  %394 = vmatprep.subr.mxu1 %v182_v3  ;;  %v114_v6 = vld [vmem:[#allocation5 + $0xd8] sm:$0xff]  ;;  %v180_v7 = vld [vmem:[#allocation5 + $0x2e8] sm:$0xff]  ;;  %p1017_p7 = scmp.lt.s32.totalorder %s876_s27, %s876_s27 }
  0x37   :  { %325 = vmatprep.subr.mxu0 %v116_v2  ;;  %395 = vmatpush1.msra.mxu1 %v181_v5  ;;  %v113_v8 = vld [vmem:[#allocation5 + $0xd0] sm:$0xff]  ;;  %v179_v9 = vld [vmem:[#allocation5 + $0x2e0] sm:$0xff]  ;;  %v178_v10 = vld [vmem:[#allocation5 + $0x2d8] sm:$0xff] }
  0x38   :  { %326 = vmatpush1.msra.mxu0 %v115_v4  ;;  %396 = vmatprep.subr.mxu1 %v180_v7  ;;  %v112_v11 = vld [vmem:[#allocation5 + $0xc8] sm:$0xff]  ;;  %v177_v12 = vld [vmem:[#allocation5 + $0x2d0] sm:$0xff]  ;;  %v111_v13 = vld [vmem:[#allocation5 + $0xc0] sm:$0xff] }
  0x39   :  { %327 = vmatprep.subr.mxu0 %v114_v6  ;;  %397 = vmatpush1.msra.mxu1 %v179_v9  ;;  %v176_v14 = vld [vmem:[#allocation5 + $0x2c8] sm:$0xff]  ;;  %v110_v15 = vld [vmem:[#allocation5 + $0xb8] sm:$0xff]  ;;  %v175_v16 = vld [vmem:[#allocation5 + $0x2c0] sm:$0xff] }
  0x3a   :  { %328 = vmatpush1.msra.mxu0 %v113_v8  ;;  %398 = vmatprep.subr.mxu1 %v178_v10  ;;  %v109_v17 = vld [vmem:[#allocation5 + $0xb0] sm:$0xff]  ;;  %v174_v18 = vld [vmem:[#allocation5 + $0x2b8] sm:$0xff]  ;;  %v108_v19 = vld [vmem:[#allocation5 + $0xa8] sm:$0xff] }
  0x3b   :  { %329 = vmatprep.subr.mxu0 %v112_v11  ;;  %399 = vmatpush1.msra.mxu1 %v177_v12  ;;  %v173_v20 = vld [vmem:[#allocation5 + $0x2b0] sm:$0xff]  ;;  %v107_v21 = vld [vmem:[#allocation5 + $0xa0] sm:$0xff]  ;;  %v172_v22 = vld [vmem:[#allocation5 + $0x2a8] sm:$0xff] }
  0x3c   :  { %330 = vmatpush1.msra.mxu0 %v111_v13  ;;  %400 = vmatprep.subr.mxu1 %v176_v14  ;;  %v106_v23 = vld [vmem:[#allocation5 + $0x98] sm:$0xff]  ;;  %v171_v24 = vld [vmem:[#allocation5 + $0x2a0] sm:$0xff]  ;;  %v105_v25 = vld [vmem:[#allocation5 + $0x90] sm:$0xff] }
  0x3d   :  { %331 = vmatprep.subr.mxu0 %v110_v15  ;;  %401 = vmatpush1.msra.mxu1 %v175_v16  ;;  %v170_v26 = vld [vmem:[#allocation5 + $0x298] sm:$0xff]  ;;  %v104_v27 = vld [vmem:[#allocation5 + $0x88] sm:$0xff]  ;;  %v169_v28 = vld [vmem:[#allocation5 + $0x290] sm:$0xff] }
  0x3e   :  { %332 = vmatpush1.msra.mxu0 %v109_v17  ;;  %402 = vmatprep.subr.mxu1 %v174_v18  ;;  %v103_v29 = vld [vmem:[#allocation5 + $0x80] sm:$0xff]  ;;  %v168_v30 = vld [vmem:[#allocation5 + $0x288] sm:$0xff]  ;;  %v102_v31 = vld [vmem:[#allocation5 + $0x78] sm:$0xff] }
  0x3f   :  { %333 = vmatprep.subr.mxu0 %v108_v19  ;;  %403 = vmatpush1.msra.mxu1 %v173_v20  ;;  %v167_v32 = vld [vmem:[#allocation5 + $0x280] sm:$0xff]  ;;  %v101_v33 = vld [vmem:[#allocation5 + $0x70] sm:$0xff]  ;;  %v166_v34 = vld [vmem:[#allocation5 + $0x278] sm:$0xff] }
  0x40   :  { %334 = vmatpush1.msra.mxu0 %v107_v21  ;;  %404 = vmatprep.subr.mxu1 %v172_v22  ;;  %v100_v35 = vld [vmem:[#allocation5 + $0x68] sm:$0xff]  ;;  %v165_v36 = vld [vmem:[#allocation5 + $0x270] sm:$0xff]  ;;  %v99_v37 = vld [vmem:[#allocation5 + $0x60] sm:$0xff] }
  0x41   :  { %335 = vmatprep.subr.mxu0 %v106_v23  ;;  %405 = vmatpush1.msra.mxu1 %v171_v24  ;;  %v164_v38 = vld [vmem:[#allocation5 + $0x268] sm:$0xff]  ;;  %v98_v39 = vld [vmem:[#allocation5 + $0x58] sm:$0xff]  ;;  %v163_v40 = vld [vmem:[#allocation5 + $0x260] sm:$0xff] }
  0x42   :  { %336 = vmatpush1.msra.mxu0 %v105_v25  ;;  %406 = vmatprep.subr.mxu1 %v170_v26  ;;  %v97_v41 = vld [vmem:[#allocation5 + $0x50] sm:$0xff]  ;;  %v162_v42 = vld [vmem:[#allocation5 + $0x258] sm:$0xff]  ;;  %v96_v43 = vld [vmem:[#allocation5 + $0x48] sm:$0xff] }
  0x43   :  { %337 = vmatprep.subr.mxu0 %v104_v27  ;;  %407 = vmatpush1.msra.mxu1 %v169_v28  ;;  %v161_v44 = vld [vmem:[#allocation5 + $0x250] sm:$0xff]  ;;  %v95_v45 = vld [vmem:[#allocation5 + $0x40] sm:$0xff]  ;;  %v160_v46 = vld [vmem:[#allocation5 + $0x248] sm:$0xff] }
  0x44   :  { %338 = vmatpush1.msra.mxu0 %v103_v29  ;;  %408 = vmatprep.subr.mxu1 %v168_v30  ;;  %v94_v47 = vld [vmem:[#allocation5 + $0x38] sm:$0xff]  ;;  %v159_v48 = vld [vmem:[#allocation5 + $0x240] sm:$0xff]  ;;  %v93_v49 = vld [vmem:[#allocation5 + $0x30] sm:$0xff] }
  0x45   :  { %339 = vmatprep.subr.mxu0 %v102_v31  ;;  %409 = vmatpush1.msra.mxu1 %v167_v32  ;;  %v158_v50 = vld [vmem:[#allocation5 + $0x238] sm:$0xff]  ;;  %v92_v51 = vld [vmem:[#allocation5 + $0x28] sm:$0xff]  ;;  %v157_v52 = vld [vmem:[#allocation5 + $0x230] sm:$0xff] }
  0x46   :  { %340 = vmatpush1.msra.mxu0 %v101_v33  ;;  %410 = vmatprep.subr.mxu1 %v166_v34  ;;  %v91_v53 = vld [vmem:[#allocation5 + $0x20] sm:$0xff]  ;;  %v156_v54 = vld [vmem:[#allocation5 + $0x228] sm:$0xff]  ;;  %v90_v55 = vld [vmem:[#allocation5 + $0x18] sm:$0xff] }
  0x47   :  { %341 = vmatprep.subr.mxu0 %v100_v35  ;;  %411 = vmatpush1.msra.mxu1 %v165_v36  ;;  %v155_v56 = vld [vmem:[#allocation5 + $0x220] sm:$0xff]  ;;  %v89_v57 = vld [vmem:[#allocation5 + $0x10] sm:$0xff]  ;;  %v154_v58 = vld [vmem:[#allocation5 + $0x218] sm:$0xff] }
  0x48   :  { %342 = vmatpush1.msra.mxu0 %v99_v37  ;;  %412 = vmatprep.subr.mxu1 %v164_v38  ;;  %v88_v59 = vld [vmem:[#allocation5 + $0x8] sm:$0xff]  ;;  %v153_v60 = vld [vmem:[#allocation5 + $0x210] sm:$0xff]  ;;  %v87_v61 = vld [vmem:[#allocation5] sm:$0xff] }
  0x49   :  { %343 = vmatprep.subr.mxu0 %v98_v39  ;;  %413 = vmatpush1.msra.mxu1 %v163_v40  ;;  %v152_v62 = vld [vmem:[#allocation5 + $0x208] sm:$0xff]  ;;  %v150_v63 = vld [vmem:[#allocation5 + $0x1f8] sm:$0xff]  ;;  %v151_v0 = vld [vmem:[#allocation5 + $0x200] sm:$0xff] }
  0x4a   :  { %344 = vmatpush1.msra.mxu0 %v97_v41  ;;  %414 = vmatprep.subr.mxu1 %v162_v42  ;;  %v149_v1 = vld [vmem:[#allocation5 + $0x1f0] sm:$0xff]  ;;  %v214_v2 = vld [vmem:[#allocation5 + $0x3f8] sm:$0xff]  ;;  %v148_v3 = vld [vmem:[#allocation5 + $0x1e8] sm:$0xff] }
  0x4b   :  { %345 = vmatprep.subr.mxu0 %v96_v43  ;;  %415 = vmatpush1.msra.mxu1 %v161_v44  ;;  %v213_v4 = vld [vmem:[#allocation5 + $0x3f0] sm:$0xff]  ;;  %v147_v5 = vld [vmem:[#allocation5 + $0x1e0] sm:$0xff]  ;;  %v212_v6 = vld [vmem:[#allocation5 + $0x3e8] sm:$0xff] }
  0x4c   :  { %346 = vmatpush1.msra.mxu0 %v95_v45  ;;  %416 = vmatprep.subr.mxu1 %v160_v46  ;;  %v146_v7 = vld [vmem:[#allocation5 + $0x1d8] sm:$0xff]  ;;  %v211_v8 = vld [vmem:[#allocation5 + $0x3e0] sm:$0xff]  ;;  %v145_v9 = vld [vmem:[#allocation5 + $0x1d0] sm:$0xff] }
  0x4d   :  { %347 = vmatprep.subr.mxu0 %v94_v47  ;;  %417 = vmatpush1.msra.mxu1 %v159_v48  ;;  %v210_v10 = vld [vmem:[#allocation5 + $0x3d8] sm:$0xff]  ;;  %v144_v11 = vld [vmem:[#allocation5 + $0x1c8] sm:$0xff]  ;;  %v209_v12 = vld [vmem:[#allocation5 + $0x3d0] sm:$0xff] }
  0x4e   :  { %348 = vmatpush1.msra.mxu0 %v93_v49  ;;  %418 = vmatprep.subr.mxu1 %v158_v50  ;;  %v143_v13 = vld [vmem:[#allocation5 + $0x1c0] sm:$0xff]  ;;  %v208_v14 = vld [vmem:[#allocation5 + $0x3c8] sm:$0xff]  ;;  %v142_v15 = vld [vmem:[#allocation5 + $0x1b8] sm:$0xff] }
  0x4f   :  { %349 = vmatprep.subr.mxu0 %v92_v51  ;;  %419 = vmatpush1.msra.mxu1 %v157_v52  ;;  %v207_v16 = vld [vmem:[#allocation5 + $0x3c0] sm:$0xff]  ;;  %v141_v17 = vld [vmem:[#allocation5 + $0x1b0] sm:$0xff]  ;;  %v206_v18 = vld [vmem:[#allocation5 + $0x3b8] sm:$0xff] }
  0x50   :  { %350 = vmatpush1.msra.mxu0 %v91_v53  ;;  %420 = vmatprep.subr.mxu1 %v156_v54  ;;  %v140_v19 = vld [vmem:[#allocation5 + $0x1a8] sm:$0xff]  ;;  %v205_v20 = vld [vmem:[#allocation5 + $0x3b0] sm:$0xff]  ;;  %v139_v21 = vld [vmem:[#allocation5 + $0x1a0] sm:$0xff] }
  0x51   :  { %351 = vmatprep.subr.mxu0 %v90_v55  ;;  %421 = vmatpush1.msra.mxu1 %v155_v56  ;;  %v204_v22 = vld [vmem:[#allocation5 + $0x3a8] sm:$0xff]  ;;  %v138_v23 = vld [vmem:[#allocation5 + $0x198] sm:$0xff]  ;;  %v203_v24 = vld [vmem:[#allocation5 + $0x3a0] sm:$0xff] }
  0x52   :  { %352 = vmatpush1.msra.mxu0 %v89_v57  ;;  %422 = vmatprep.subr.mxu1 %v154_v58  ;;  %v137_v25 = vld [vmem:[#allocation5 + $0x190] sm:$0xff]  ;;  %v202_v26 = vld [vmem:[#allocation5 + $0x398] sm:$0xff]  ;;  %v136_v27 = vld [vmem:[#allocation5 + $0x188] sm:$0xff] }
  0x53   :  { %353 = vmatprep.subr.mxu0 %v88_v59  ;;  %423 = vmatpush1.msra.mxu1 %v153_v60  ;;  %v201_v28 = vld [vmem:[#allocation5 + $0x390] sm:$0xff]  ;;  %v135_v29 = vld [vmem:[#allocation5 + $0x180] sm:$0xff]  ;;  %v200_v30 = vld [vmem:[#allocation5 + $0x388] sm:$0xff] }
  0x54   :  { %354 = vmatpush1.msra.mxu0 %v87_v61  ;;  %424 = vmatprep.subr.mxu1 %v152_v62  ;;  %v134_v31 = vld [vmem:[#allocation5 + $0x178] sm:$0xff]  ;;  %v199_v32 = vld [vmem:[#allocation5 + $0x380] sm:$0xff]  ;;  %v133_v33 = vld [vmem:[#allocation5 + $0x170] sm:$0xff] }
  0x55   :  { %355 = vmatprep.subr.mxu0 %v150_v63  ;;  %425 = vmatpush1.msra.mxu1 %v151_v0  ;;  %v198_v34 = vld [vmem:[#allocation5 + $0x378] sm:$0xff]  ;;  %v132_v35 = vld [vmem:[#allocation5 + $0x168] sm:$0xff]  ;;  %v197_v36 = vld [vmem:[#allocation5 + $0x370] sm:$0xff] }
  0x56   :  { %356 = vmatpush2.msra.mxu0 %v149_v1  ;;  %426 = vmatprep.subr.mxu1 %v214_v2  ;;  %v131_v37 = vld [vmem:[#allocation5 + $0x160] sm:$0xff]  ;;  %v196_v38 = vld [vmem:[#allocation5 + $0x368] sm:$0xff]  ;;  %v130_v39 = vld [vmem:[#allocation5 + $0x158] sm:$0xff] }
  0x57   :  { %357 = vmatprep.subr.mxu0 %v148_v3  ;;  %427 = vmatpush2.msra.mxu1 %v213_v4  ;;  %v195_v40 = vld [vmem:[#allocation5 + $0x360] sm:$0xff]  ;;  %v129_v41 = vld [vmem:[#allocation5 + $0x150] sm:$0xff]  ;;  %v194_v42 = vld [vmem:[#allocation5 + $0x358] sm:$0xff] }
  0x58   :  { %358 = vmatpush2.msra.mxu0 %v147_v5  ;;  %428 = vmatprep.subr.mxu1 %v212_v6  ;;  %v128_v43 = vld [vmem:[#allocation5 + $0x148] sm:$0xff]  ;;  %v193_v44 = vld [vmem:[#allocation5 + $0x350] sm:$0xff]  ;;  %v127_v45 = vld [vmem:[#allocation5 + $0x140] sm:$0xff] }
  0x59   :  { %359 = vmatprep.subr.mxu0 %v146_v7  ;;  %429 = vmatpush2.msra.mxu1 %v211_v8  ;;  %v192_v46 = vld [vmem:[#allocation5 + $0x348] sm:$0xff]  ;;  %v126_v47 = vld [vmem:[#allocation5 + $0x138] sm:$0xff]  ;;  %v191_v48 = vld [vmem:[#allocation5 + $0x340] sm:$0xff] }
  0x5a   :  { %360 = vmatpush2.msra.mxu0 %v145_v9  ;;  %430 = vmatprep.subr.mxu1 %v210_v10  ;;  %v125_v49 = vld [vmem:[#allocation5 + $0x130] sm:$0xff]  ;;  %v190_v50 = vld [vmem:[#allocation5 + $0x338] sm:$0xff]  ;;  %v124_v51 = vld [vmem:[#allocation5 + $0x128] sm:$0xff] }
  0x5b   :  { %361 = vmatprep.subr.mxu0 %v144_v11  ;;  %431 = vmatpush2.msra.mxu1 %v209_v12  ;;  %v189_v52 = vld [vmem:[#allocation5 + $0x330] sm:$0xff]  ;;  %v123_v53 = vld [vmem:[#allocation5 + $0x120] sm:$0xff]  ;;  %v188_v54 = vld [vmem:[#allocation5 + $0x328] sm:$0xff] }
  0x5c   :  { %362 = vmatpush2.msra.mxu0 %v143_v13  ;;  %432 = vmatprep.subr.mxu1 %v208_v14  ;;  %v122_v55 = vld [vmem:[#allocation5 + $0x118] sm:$0xff]  ;;  %v187_v56 = vld [vmem:[#allocation5 + $0x320] sm:$0xff]  ;;  %v121_v57 = vld [vmem:[#allocation5 + $0x110] sm:$0xff] }
  0x5d   :  { %363 = vmatprep.subr.mxu0 %v142_v15  ;;  %433 = vmatpush2.msra.mxu1 %v207_v16  ;;  %v186_v58 = vld [vmem:[#allocation5 + $0x318] sm:$0xff]  ;;  %v120_v59 = vld [vmem:[#allocation5 + $0x108] sm:$0xff]  ;;  %v81_v60 = vld [vmem:[#allocation2 + $0x8] sm:$0xff] }
  0x5e   :  { %364 = vmatpush2.msra.mxu0 %v141_v17  ;;  %434 = vmatprep.subr.mxu1 %v206_v18  ;;  %v119_v61 = vld [vmem:[#allocation5 + $0x100] sm:$0xff]  ;;  %v185_v62 = vld [vmem:[#allocation5 + $0x310] sm:$0xff]  ;;  %v80_v63 = vld [vmem:[#allocation2] sm:$0xff] }
  0x5f   :  { %365 = vmatprep.subr.mxu0 %v140_v19  ;;  %435 = vmatpush2.msra.mxu1 %v205_v20  ;;  %v184_v0 = vld [vmem:[#allocation5 + $0x308] sm:$0xff]  ;;  %v246_v1 = vld [vmem:[#allocation5 + $0x4f8] sm:$0xff]  ;;  %v183_v2 = vld [vmem:[#allocation5 + $0x300] sm:$0xff] }
  0x60   :  { %366 = vmatpush2.msra.mxu0 %v139_v21  ;;  %436 = vmatprep.subr.mxu1 %v204_v22  ;;  %v83_v3 = vld [vmem:[#allocation2 + $0x18] sm:$0xff]  ;;  %v245_v4 = vld [vmem:[#allocation5 + $0x4f0] sm:$0xff]  ;;  %v82_v5 = vld [vmem:[#allocation2 + $0x10] sm:$0xff] }
  0x61   :  { %367 = vmatprep.subr.mxu0 %v138_v23  ;;  %437 = vmatpush2.msra.mxu1 %v203_v24  ;;  %v244_v6 = vld [vmem:[#allocation5 + $0x4e8] sm:$0xff]  ;;  %v243_v7 = vld [vmem:[#allocation5 + $0x4e0] sm:$0xff]  ;;  %v310_v8 = vld [vmem:[#allocation5 + $0x6f8] sm:$0xff] }
  0x62   :  { %368 = vmatpush2.msra.mxu0 %v137_v25  ;;  %438 = vmatprep.subr.mxu1 %v202_v26  ;;  %v242_v9 = vld [vmem:[#allocation5 + $0x4d8] sm:$0xff]  ;;  %v309_v10 = vld [vmem:[#allocation5 + $0x6f0] sm:$0xff]  ;;  %v308_v12 = vld [vmem:[#allocation5 + $0x6e8] sm:$0xff] }
  0x63   :  { %369 = vmatprep.subr.mxu0 %v136_v27  ;;  %439 = vmatpush2.msra.mxu1 %v201_v28  ;;  %v241_v11 = vld [vmem:[#allocation5 + $0x4d0] sm:$0xff]  ;;  %v240_v13 = vld [vmem:[#allocation5 + $0x4c8] sm:$0xff]  ;;  %v307_v14 = vld [vmem:[#allocation5 + $0x6e0] sm:$0xff] }
  0x64   :  { %370 = vmatpush2.msra.mxu0 %v135_v29  ;;  %440 = vmatprep.subr.mxu1 %v200_v30  ;;  %v239_v15 = vld [vmem:[#allocation5 + $0x4c0] sm:$0xff]  ;;  %v306_v16 = vld [vmem:[#allocation5 + $0x6d8] sm:$0xff]  ;;  %v305_v18 = vld [vmem:[#allocation5 + $0x6d0] sm:$0xff] }
  0x65   :  { %371 = vmatprep.subr.mxu0 %v134_v31  ;;  %441 = vmatpush2.msra.mxu1 %v199_v32  ;;  %v238_v17 = vld [vmem:[#allocation5 + $0x4b8] sm:$0xff]  ;;  %v237_v19 = vld [vmem:[#allocation5 + $0x4b0] sm:$0xff]  ;;  %v304_v20 = vld [vmem:[#allocation5 + $0x6c8] sm:$0xff] }
  0x66   :  { %372 = vmatpush2.msra.mxu0 %v133_v33  ;;  %442 = vmatprep.subr.mxu1 %v198_v34  ;;  %v236_v21 = vld [vmem:[#allocation5 + $0x4a8] sm:$0xff]  ;;  %v303_v22 = vld [vmem:[#allocation5 + $0x6c0] sm:$0xff]  ;;  %v302_v24 = vld [vmem:[#allocation5 + $0x6b8] sm:$0xff] }
  0x67   :  { %373 = vmatprep.subr.mxu0 %v132_v35  ;;  %443 = vmatpush2.msra.mxu1 %v197_v36  ;;  %v235_v23 = vld [vmem:[#allocation5 + $0x4a0] sm:$0xff]  ;;  %v234_v25 = vld [vmem:[#allocation5 + $0x498] sm:$0xff]  ;;  %v301_v26 = vld [vmem:[#allocation5 + $0x6b0] sm:$0xff] }
  0x68   :  { %374 = vmatpush2.msra.mxu0 %v131_v37  ;;  %444 = vmatprep.subr.mxu1 %v196_v38  ;;  %v233_v27 = vld [vmem:[#allocation5 + $0x490] sm:$0xff]  ;;  %v300_v28 = vld [vmem:[#allocation5 + $0x6a8] sm:$0xff]  ;;  %v299_v30 = vld [vmem:[#allocation5 + $0x6a0] sm:$0xff] }
  0x69   :  { %375 = vmatprep.subr.mxu0 %v130_v39  ;;  %445 = vmatpush2.msra.mxu1 %v195_v40  ;;  %v232_v29 = vld [vmem:[#allocation5 + $0x488] sm:$0xff]  ;;  %v231_v31 = vld [vmem:[#allocation5 + $0x480] sm:$0xff]  ;;  %v298_v32 = vld [vmem:[#allocation5 + $0x698] sm:$0xff] }
  0x6a   :  { %376 = vmatpush2.msra.mxu0 %v129_v41  ;;  %446 = vmatprep.subr.mxu1 %v194_v42  ;;  %v230_v33 = vld [vmem:[#allocation5 + $0x478] sm:$0xff]  ;;  %v297_v34 = vld [vmem:[#allocation5 + $0x690] sm:$0xff]  ;;  %v296_v36 = vld [vmem:[#allocation5 + $0x688] sm:$0xff] }
  0x6b   :  { %377 = vmatprep.subr.mxu0 %v128_v43  ;;  %447 = vmatpush2.msra.mxu1 %v193_v44  ;;  %v229_v35 = vld [vmem:[#allocation5 + $0x470] sm:$0xff]  ;;  %v228_v37 = vld [vmem:[#allocation5 + $0x468] sm:$0xff]  ;;  %v295_v38 = vld [vmem:[#allocation5 + $0x680] sm:$0xff] }
  0x6c   :  { %378 = vmatpush2.msra.mxu0 %v127_v45  ;;  %448 = vmatprep.subr.mxu1 %v192_v46  ;;  %v227_v39 = vld [vmem:[#allocation5 + $0x460] sm:$0xff]  ;;  %v294_v40 = vld [vmem:[#allocation5 + $0x678] sm:$0xff]  ;;  %v293_v42 = vld [vmem:[#allocation5 + $0x670] sm:$0xff] }
  0x6d   :  { %379 = vmatprep.subr.mxu0 %v126_v47  ;;  %449 = vmatpush2.msra.mxu1 %v191_v48  ;;  %v226_v41 = vld [vmem:[#allocation5 + $0x458] sm:$0xff]  ;;  %v225_v43 = vld [vmem:[#allocation5 + $0x450] sm:$0xff]  ;;  %v292_v44 = vld [vmem:[#allocation5 + $0x668] sm:$0xff] }
  0x6e   :  { %380 = vmatpush2.msra.mxu0 %v125_v49  ;;  %450 = vmatprep.subr.mxu1 %v190_v50  ;;  %v224_v45 = vld [vmem:[#allocation5 + $0x448] sm:$0xff]  ;;  %v291_v46 = vld [vmem:[#allocation5 + $0x660] sm:$0xff]  ;;  %v290_v48 = vld [vmem:[#allocation5 + $0x658] sm:$0xff] }
  0x6f   :  { %381 = vmatprep.subr.mxu0 %v124_v51  ;;  %451 = vmatpush2.msra.mxu1 %v189_v52  ;;  %v223_v47 = vld [vmem:[#allocation5 + $0x440] sm:$0xff]  ;;  %v222_v49 = vld [vmem:[#allocation5 + $0x438] sm:$0xff]  ;;  %v289_v50 = vld [vmem:[#allocation5 + $0x650] sm:$0xff] }
  0x70   :  { %382 = vmatpush2.msra.mxu0 %v123_v53  ;;  %452 = vmatprep.subr.mxu1 %v188_v54  ;;  %v221_v51 = vld [vmem:[#allocation5 + $0x430] sm:$0xff]  ;;  %v288_v52 = vld [vmem:[#allocation5 + $0x648] sm:$0xff]  ;;  %v287_v54 = vld [vmem:[#allocation5 + $0x640] sm:$0xff] }
  0x71   :  { %383 = vmatprep.subr.mxu0 %v122_v55  ;;  %453 = vmatpush2.msra.mxu1 %v187_v56  ;;  %v220_v53 = vld [vmem:[#allocation5 + $0x428] sm:$0xff]  ;;  %v219_v55 = vld [vmem:[#allocation5 + $0x420] sm:$0xff]  ;;  %v286_v56 = vld [vmem:[#allocation5 + $0x638] sm:$0xff] }
  0x72   :  { %384 = vmatpush2.msra.mxu0 %v121_v57  ;;  %454 = vmatprep.subr.mxu1 %v186_v58  ;;  %v218_v57 = vld [vmem:[#allocation5 + $0x418] sm:$0xff]  ;;  %v285_v58 = vld [vmem:[#allocation5 + $0x630] sm:$0xff] }
  0x73   :  { %385 = vmatprep.subr.mxu0 %v120_v59  ;;  %387 = vmatprep.mubr.f32.mxu0 %v81_v60  ;;  %v217_v59 = vld [vmem:[#allocation5 + $0x410] sm:$0xff]  ;;  %v284_v60 = vld [vmem:[#allocation5 + $0x628] sm:$0xff] }
  0x74   :  { %386 = vmatpush2.msra.mxu0 %v119_v61  ;;  %455 = vmatpush2.msra.mxu1 %v185_v62  ;;  %v216_v61 = vld [vmem:[#allocation5 + $0x408] sm:$0xff]  ;;  %v283_v62 = vld [vmem:[#allocation5 + $0x620] sm:$0xff] }
  0x75   :  { %388 = vmatmul.mubr.f32.vlgmr.msra.gmra.mxu0 %v80_v63  ;;  %456 = vmatprep.subr.mxu1 %v184_v0  ;;  %v215_v63 = vld [vmem:[#allocation5 + $0x400] sm:$0xff]  ;;  %v282_v0 = vld [vmem:[#allocation5 + $0x618] sm:$0xff] }
  0x76   :  { %465 = vmatprep.subr.mxu0 %v246_v1  ;;  %457 = vmatpush2.msra.mxu1 %v183_v2  ;;  %v278_v1 = vld [vmem:[#allocation5 + $0x5f8] sm:$0xff]  ;;  %v281_v2 = vld [vmem:[#allocation5 + $0x610] sm:$0xff] }
  0x77   :  { %458 = vmatprep.mubr.f32.mxu1 %v83_v3  ;;  %466 = vmatpush1.msra.mxu0 %v245_v4  ;;  %v277_v3 = vld [vmem:[#allocation5 + $0x5f0] sm:$0xff]  ;;  %v280_v4 = vld [vmem:[#allocation5 + $0x608] sm:$0xff] }
  0x78   :  { %459 = vmatmul.mubr.f32.vlgmr.msra.gmra.mxu1 %v82_v5  ;;  %467 = vmatprep.subr.mxu0 %v244_v6  ;;  %v276_v5 = vld [vmem:[#allocation5 + $0x5e8] sm:$0xff]  ;;  %v85_v6 = vld [vmem:[#allocation2 + $0x28] sm:$0xff] }
  0x79   :  { %468 = vmatpush1.msra.mxu0 %v243_v7  ;;  %536 = vmatprep.subr.mxu1 %v310_v8  ;;  %v275_v7 = vld [vmem:[#allocation5 + $0x5e0] sm:$0xff] }
  0x7a   :  { %469 = vmatprep.subr.mxu0 %v242_v9  ;;  %537 = vmatpush1.msra.mxu1 %v309_v10  ;;  %v279_v8 = vld [vmem:[#allocation5 + $0x600] sm:$0xff]  ;;  %v274_v9 = vld [vmem:[#allocation5 + $0x5d8] sm:$0xff]  ;;  %v273_v10 = vld [vmem:[#allocation5 + $0x5d0] sm:$0xff] }
  0x7b   :  { %470 = vmatpush1.msra.mxu0 %v241_v11  ;;  %538 = vmatprep.subr.mxu1 %v308_v12  ;;  %v86_v11 = vld [vmem:[#allocation2 + $0x30] sm:$0xff]  ;;  %v272_v12 = vld [vmem:[#allocation5 + $0x5c8] sm:$0xff] }
  0x7c   :  { %471 = vmatprep.subr.mxu0 %v240_v13  ;;  %539 = vmatpush1.msra.mxu1 %v307_v14  ;;  %v271_v13 = vld [vmem:[#allocation5 + $0x5c0] sm:$0xff]  ;;  %v1048_v14 = vmov 0.0  }
  0x7d   :  { %472 = vmatpush1.msra.mxu0 %v239_v15  ;;  %540 = vmatprep.subr.mxu1 %v306_v16  ;;  %v270_v15 = vld [vmem:[#allocation5 + $0x5b8] sm:$0xff]  ;;  %v269_v16 = vld [vmem:[#allocation5 + $0x5b0] sm:$0xff] }
  0x7e   :  { %473 = vmatprep.subr.mxu0 %v238_v17  ;;  %541 = vmatpush1.msra.mxu1 %v305_v18  ;;  %v268_v17 = vld [vmem:[#allocation5 + $0x5a8] sm:$0xff]  ;;  %v267_v18 = vld [vmem:[#allocation5 + $0x5a0] sm:$0xff] }
  0x7f   :  { %474 = vmatpush1.msra.mxu0 %v237_v19  ;;  %542 = vmatprep.subr.mxu1 %v304_v20  ;;  %v266_v19 = vld [vmem:[#allocation5 + $0x598] sm:$0xff]  ;;  %v265_v20 = vld [vmem:[#allocation5 + $0x590] sm:$0xff] }
  0x80   :  { %475 = vmatprep.subr.mxu0 %v236_v21  ;;  %543 = vmatpush1.msra.mxu1 %v303_v22  ;;  %v264_v21 = vld [vmem:[#allocation5 + $0x588] sm:$0xff]  ;;  %v263_v22 = vld [vmem:[#allocation5 + $0x580] sm:$0xff] }
  0x81   :  { %476 = vmatpush1.msra.mxu0 %v235_v23  ;;  %544 = vmatprep.subr.mxu1 %v302_v24  ;;  %v262_v23 = vld [vmem:[#allocation5 + $0x578] sm:$0xff]  ;;  %v261_v24 = vld [vmem:[#allocation5 + $0x570] sm:$0xff] }
  0x82   :  { %477 = vmatprep.subr.mxu0 %v234_v25  ;;  %545 = vmatpush1.msra.mxu1 %v301_v26  ;;  %v260_v25 = vld [vmem:[#allocation5 + $0x568] sm:$0xff]  ;;  %v259_v26 = vld [vmem:[#allocation5 + $0x560] sm:$0xff] }
  0x83   :  { %478 = vmatpush1.msra.mxu0 %v233_v27  ;;  %546 = vmatprep.subr.mxu1 %v300_v28  ;;  %v258_v27 = vld [vmem:[#allocation5 + $0x558] sm:$0xff]  ;;  %v257_v28 = vld [vmem:[#allocation5 + $0x550] sm:$0xff] }
  0x84   :  { %479 = vmatprep.subr.mxu0 %v232_v29  ;;  %547 = vmatpush1.msra.mxu1 %v299_v30  ;;  %v256_v29 = vld [vmem:[#allocation5 + $0x548] sm:$0xff]  ;;  %v255_v30 = vld [vmem:[#allocation5 + $0x540] sm:$0xff] }
  0x85   :  { %480 = vmatpush1.msra.mxu0 %v231_v31  ;;  %548 = vmatprep.subr.mxu1 %v298_v32  ;;  %v254_v31 = vld [vmem:[#allocation5 + $0x538] sm:$0xff]  ;;  %v253_v32 = vld [vmem:[#allocation5 + $0x530] sm:$0xff] }
  0x86   :  { %481 = vmatprep.subr.mxu0 %v230_v33  ;;  %549 = vmatpush1.msra.mxu1 %v297_v34  ;;  %v252_v33 = vld [vmem:[#allocation5 + $0x528] sm:$0xff]  ;;  %v251_v34 = vld [vmem:[#allocation5 + $0x520] sm:$0xff] }
  0x87   :  { %482 = vmatpush1.msra.mxu0 %v229_v35  ;;  %550 = vmatprep.subr.mxu1 %v296_v36  ;;  %v250_v35 = vld [vmem:[#allocation5 + $0x518] sm:$0xff]  ;;  %v249_v36 = vld [vmem:[#allocation5 + $0x510] sm:$0xff] }
  0x88   :  { %483 = vmatprep.subr.mxu0 %v228_v37  ;;  %551 = vmatpush1.msra.mxu1 %v295_v38  ;;  %v248_v37 = vld [vmem:[#allocation5 + $0x508] sm:$0xff]  ;;  %v247_v38 = vld [vmem:[#allocation5 + $0x500] sm:$0xff] }
  0x89   :  { %484 = vmatpush1.msra.mxu0 %v227_v39  ;;  %552 = vmatprep.subr.mxu1 %v294_v40  ;;  %v84_v39 = vld [vmem:[#allocation2 + $0x20] sm:$0xff]  ;;  %v640_v40 = vld [vmem:[#allocation7 + $0xf8] sm:$0xff] }
  0x8a   :  { %485 = vmatprep.subr.mxu0 %v226_v41  ;;  %553 = vmatpush1.msra.mxu1 %v293_v42  ;;  %v639_v41 = vld [vmem:[#allocation7 + $0xf0] sm:$0xff]  ;;  %v638_v42 = vld [vmem:[#allocation7 + $0xe8] sm:$0xff] }
  0x8b   :  { %486 = vmatpush1.msra.mxu0 %v225_v43  ;;  %554 = vmatprep.subr.mxu1 %v292_v44  ;;  %v637_v43 = vld [vmem:[#allocation7 + $0xe0] sm:$0xff]  ;;  %v636_v44 = vld [vmem:[#allocation7 + $0xd8] sm:$0xff] }
  0x8c   :  { %487 = vmatprep.subr.mxu0 %v224_v45  ;;  %555 = vmatpush1.msra.mxu1 %v291_v46  ;;  %v635_v45 = vld [vmem:[#allocation7 + $0xd0] sm:$0xff]  ;;  %v634_v46 = vld [vmem:[#allocation7 + $0xc8] sm:$0xff] }
  0x8d   :  { %488 = vmatpush1.msra.mxu0 %v223_v47  ;;  %556 = vmatprep.subr.mxu1 %v290_v48  ;;  %v633_v47 = vld [vmem:[#allocation7 + $0xc0] sm:$0xff]  ;;  %v632_v48 = vld [vmem:[#allocation7 + $0xb8] sm:$0xff] }
  0x8e   :  { %489 = vmatprep.subr.mxu0 %v222_v49  ;;  %557 = vmatpush1.msra.mxu1 %v289_v50  ;;  %v631_v49 = vld [vmem:[#allocation7 + $0xb0] sm:$0xff]  ;;  %v630_v50 = vld [vmem:[#allocation7 + $0xa8] sm:$0xff] }
  0x8f   :  { %490 = vmatpush1.msra.mxu0 %v221_v51  ;;  %558 = vmatprep.subr.mxu1 %v288_v52  ;;  %v629_v51 = vld [vmem:[#allocation7 + $0xa0] sm:$0xff]  ;;  %v628_v52 = vld [vmem:[#allocation7 + $0x98] sm:$0xff] }
  0x90   :  { %491 = vmatprep.subr.mxu0 %v220_v53  ;;  %559 = vmatpush1.msra.mxu1 %v287_v54  ;;  %v627_v53 = vld [vmem:[#allocation7 + $0x90] sm:$0xff]  ;;  %v626_v54 = vld [vmem:[#allocation7 + $0x88] sm:$0xff] }
  0x91   :  { %492 = vmatpush1.msra.mxu0 %v219_v55  ;;  %560 = vmatprep.subr.mxu1 %v286_v56  ;;  %v625_v55 = vld [vmem:[#allocation7 + $0x80] sm:$0xff]  ;;  %v624_v56 = vld [vmem:[#allocation7 + $0x78] sm:$0xff] }
  0x92   :  { %493 = vmatprep.subr.mxu0 %v218_v57  ;;  %561 = vmatpush1.msra.mxu1 %v285_v58  ;;  %v623_v57 = vld [vmem:[#allocation7 + $0x70] sm:$0xff]  ;;  %v622_v58 = vld [vmem:[#allocation7 + $0x68] sm:$0xff] }
  0x93   :  { %494 = vmatpush1.msra.mxu0 %v217_v59  ;;  %562 = vmatprep.subr.mxu1 %v284_v60  ;;  %v621_v59 = vld [vmem:[#allocation7 + $0x60] sm:$0xff]  ;;  %v620_v60 = vld [vmem:[#allocation7 + $0x58] sm:$0xff] }
  0x94   :  { %495 = vmatprep.subr.mxu0 %v216_v61  ;;  %563 = vmatpush1.msra.mxu1 %v283_v62  ;;  %v619_v61 = vld [vmem:[#allocation7 + $0x50] sm:$0xff]  ;;  %v618_v62 = vld [vmem:[#allocation7 + $0x48] sm:$0xff] }
  0x95   :  { %496 = vmatpush1.msra.mxu0 %v215_v63  ;;  %564 = vmatprep.subr.mxu1 %v282_v0  ;;  %v617_v63 = vld [vmem:[#allocation7 + $0x40] sm:$0xff]  ;;  %v616_v0 = vld [vmem:[#allocation7 + $0x38] sm:$0xff] }
  0x96   :  { %497 = vmatprep.subr.mxu0 %v278_v1  ;;  %565 = vmatpush1.msra.mxu1 %v281_v2  ;;  %v615_v1 = vld [vmem:[#allocation7 + $0x30] sm:$0xff]  ;;  %v614_v2 = vld [vmem:[#allocation7 + $0x28] sm:$0xff] }
  0x97   :  { %498 = vmatpush2.msra.mxu0 %v277_v3  ;;  %566 = vmatprep.subr.mxu1 %v280_v4  ;;  %v613_v3 = vld [vmem:[#allocation7 + $0x20] sm:$0xff]  ;;  %v612_v4 = vld [vmem:[#allocation7 + $0x18] sm:$0xff] }
  0x98   :  { %499 = vmatprep.subr.mxu0 %v276_v5  ;;  %529 = vmatprep.mubr.f32.mxu0 %v85_v6  ;;  %v611_v5 = vld [vmem:[#allocation7 + $0x10] sm:$0xff]  ;;  %v610_v6 = vld [vmem:[#allocation7 + $0x8] sm:$0xff] }
  0x99   :  { %500 = vmatpush2.msra.mxu0 %v275_v7  ;;  %567 = vmatpush1.msra.mxu1 %v279_v8  ;;  %v609_v7 = vld [vmem:[#allocation7] sm:$0xff]  ;;  %v672_v8 = vld [vmem:[#allocation7 + $0x1f8] sm:$0xff] }
  0x9a   :  { %501 = vmatprep.subr.mxu0 %v274_v9  ;;  %600 = vmatprep.mubr.f32.mxu1 %v1048_v14  ;;  %v671_v9 = vld [vmem:[#allocation7 + $0x1f0] sm:$0xff]  ;;  %v666_v14 = vld [vmem:[#allocation7 + $0x1c8] sm:$0xff] }
  0x9b   :  { %502 = vmatpush2.msra.mxu0 %v273_v10  ;;  %601 = vmatmul.mubr.f32.vlgmr.msra.gmra.mxu1 %v86_v11  ;;  %v670_v10 = vld [vmem:[#allocation7 + $0x1e8] sm:$0xff]  ;;  %v669_v11 = vld [vmem:[#allocation7 + $0x1e0] sm:$0xff] }
  0x9c   :  { %503 = vmatprep.subr.mxu0 %v272_v12  ;;  %685 = vmatprep.subr.mxu1 %v640_v40  ;;  %v668_v12 = vld [vmem:[#allocation7 + $0x1d8] sm:$0xff] }
  0x9d   :  { %504 = vmatpush2.msra.mxu0 %v271_v13  ;;  %686 = vmatpush1.msra.mxu1 %v639_v41  ;;  %v667_v13 = vld [vmem:[#allocation7 + $0x1d0] sm:$0xff]  ;;  %v789_v40 = vld [vmem:[#allocation8 + $0xf8] sm:$0xff] }
  0x9e   :  { %505 = vmatprep.subr.mxu0 %v270_v15  ;;  %687 = vmatprep.subr.mxu1 %v638_v42  ;;  %v665_v15 = vld [vmem:[#allocation7 + $0x1c0] sm:$0xff]  ;;  %v773_v41 = vld [vmem:[#allocation8 + $0x78] sm:$0xff]  ;;  %v788_v42 = vld [vmem:[#allocation8 + $0xf0] sm:$0xff] }
  0x9f   :  { %506 = vmatpush2.msra.mxu0 %v269_v16  ;;  %688 = vmatpush1.msra.mxu1 %v637_v43  ;;  %v664_v16 = vld [vmem:[#allocation7 + $0x1b8] sm:$0xff]  ;;  %v772_v43 = vld [vmem:[#allocation8 + $0x70] sm:$0xff] }
  0xa0   :  { %507 = vmatprep.subr.mxu0 %v268_v17  ;;  %689 = vmatprep.subr.mxu1 %v636_v44  ;;  %v663_v17 = vld [vmem:[#allocation7 + $0x1b0] sm:$0xff]  ;;  %v787_v44 = vld [vmem:[#allocation8 + $0xe8] sm:$0xff] }
  0xa1   :  { %508 = vmatpush2.msra.mxu0 %v267_v18  ;;  %690 = vmatpush1.msra.mxu1 %v635_v45  ;;  %v662_v18 = vld [vmem:[#allocation7 + $0x1a8] sm:$0xff] }
  0xa2   :  { %509 = vmatprep.subr.mxu0 %v266_v19  ;;  %691 = vmatprep.subr.mxu1 %v634_v46  ;;  %v661_v19 = vld [vmem:[#allocation7 + $0x1a0] sm:$0xff]  ;;  %v771_v45 = vld [vmem:[#allocation8 + $0x68] sm:$0xff] }
  0xa3   :  { %510 = vmatpush2.msra.mxu0 %v265_v20  ;;  %692 = vmatpush1.msra.mxu1 %v633_v47  ;;  %v660_v20 = vld [vmem:[#allocation7 + $0x198] sm:$0xff]  ;;  %v786_v46 = vld [vmem:[#allocation8 + $0xe0] sm:$0xff] }
  0xa4   :  { %511 = vmatprep.subr.mxu0 %v264_v21  ;;  %693 = vmatprep.subr.mxu1 %v632_v48  ;;  %v659_v21 = vld [vmem:[#allocation7 + $0x190] sm:$0xff]  ;;  %v770_v47 = vld [vmem:[#allocation8 + $0x60] sm:$0xff]  ;;  %v785_v48 = vld [vmem:[#allocation8 + $0xd8] sm:$0xff] }
  0xa5   :  { %512 = vmatpush2.msra.mxu0 %v263_v22  ;;  %694 = vmatpush1.msra.mxu1 %v631_v49  ;;  %v658_v22 = vld [vmem:[#allocation7 + $0x188] sm:$0xff]  ;;  %v769_v49 = vld [vmem:[#allocation8 + $0x58] sm:$0xff] }
  0xa6   :  { %513 = vmatprep.subr.mxu0 %v262_v23  ;;  %695 = vmatprep.subr.mxu1 %v630_v50  ;;  %v657_v23 = vld [vmem:[#allocation7 + $0x180] sm:$0xff]  ;;  %v784_v50 = vld [vmem:[#allocation8 + $0xd0] sm:$0xff] }
  0xa7   :  { %514 = vmatpush2.msra.mxu0 %v261_v24  ;;  %696 = vmatpush1.msra.mxu1 %v629_v51  ;;  %v656_v24 = vld [vmem:[#allocation7 + $0x178] sm:$0xff]  ;;  %v768_v51 = vld [vmem:[#allocation8 + $0x50] sm:$0xff] }
  0xa8   :  { %515 = vmatprep.subr.mxu0 %v260_v25  ;;  %697 = vmatprep.subr.mxu1 %v628_v52  ;;  %v655_v25 = vld [vmem:[#allocation7 + $0x170] sm:$0xff]  ;;  %v783_v52 = vld [vmem:[#allocation8 + $0xc8] sm:$0xff] }
  0xa9   :  { %516 = vmatpush2.msra.mxu0 %v259_v26  ;;  %698 = vmatpush1.msra.mxu1 %v627_v53  ;;  %v654_v26 = vld [vmem:[#allocation7 + $0x168] sm:$0xff] }
  0xaa   :  { %517 = vmatprep.subr.mxu0 %v258_v27  ;;  %699 = vmatprep.subr.mxu1 %v626_v54  ;;  %v653_v27 = vld [vmem:[#allocation7 + $0x160] sm:$0xff]  ;;  %v767_v53 = vld [vmem:[#allocation8 + $0x48] sm:$0xff] }
  0xab   :  { %518 = vmatpush2.msra.mxu0 %v257_v28  ;;  %700 = vmatpush1.msra.mxu1 %v625_v55  ;;  %v652_v28 = vld [vmem:[#allocation7 + $0x158] sm:$0xff]  ;;  %v782_v54 = vld [vmem:[#allocation8 + $0xc0] sm:$0xff] }
  0xac   :  { %519 = vmatprep.subr.mxu0 %v256_v29  ;;  %701 = vmatprep.subr.mxu1 %v624_v56  ;;  %v651_v29 = vld [vmem:[#allocation7 + $0x150] sm:$0xff]  ;;  %v766_v55 = vld [vmem:[#allocation8 + $0x40] sm:$0xff]  ;;  %v781_v56 = vld [vmem:[#allocation8 + $0xb8] sm:$0xff] }
  0xad   :  { %520 = vmatpush2.msra.mxu0 %v255_v30  ;;  %702 = vmatpush1.msra.mxu1 %v623_v57  ;;  %v650_v30 = vld [vmem:[#allocation7 + $0x148] sm:$0xff]  ;;  %v765_v57 = vld [vmem:[#allocation8 + $0x38] sm:$0xff] }
  0xae   :  { %521 = vmatprep.subr.mxu0 %v254_v31  ;;  %703 = vmatprep.subr.mxu1 %v622_v58  ;;  %v649_v31 = vld [vmem:[#allocation7 + $0x140] sm:$0xff]  ;;  %v780_v58 = vld [vmem:[#allocation8 + $0xb0] sm:$0xff] }
  0xaf   :  { %522 = vmatpush2.msra.mxu0 %v253_v32  ;;  %704 = vmatpush1.msra.mxu1 %v621_v59  ;;  %v648_v32 = vld [vmem:[#allocation7 + $0x138] sm:$0xff]  ;;  %v764_v59 = vld [vmem:[#allocation8 + $0x30] sm:$0xff] }
  0xb0   :  { %523 = vmatprep.subr.mxu0 %v252_v33  ;;  %705 = vmatprep.subr.mxu1 %v620_v60  ;;  %v647_v33 = vld [vmem:[#allocation7 + $0x130] sm:$0xff]  ;;  %v779_v60 = vld [vmem:[#allocation8 + $0xa8] sm:$0xff] }
  0xb1   :  { %524 = vmatpush2.msra.mxu0 %v251_v34  ;;  %706 = vmatpush1.msra.mxu1 %v619_v61  ;;  %v646_v34 = vld [vmem:[#allocation7 + $0x128] sm:$0xff] }
  0xb2   :  { %525 = vmatprep.subr.mxu0 %v250_v35  ;;  %707 = vmatprep.subr.mxu1 %v618_v62  ;;  %v645_v35 = vld [vmem:[#allocation7 + $0x120] sm:$0xff]  ;;  %v763_v61 = vld [vmem:[#allocation8 + $0x28] sm:$0xff] }
  0xb3   :  { %526 = vmatpush2.msra.mxu0 %v249_v36  ;;  %708 = vmatpush1.msra.mxu1 %v617_v63  ;;  %v644_v36 = vld [vmem:[#allocation7 + $0x118] sm:$0xff]  ;;  %v778_v62 = vld [vmem:[#allocation8 + $0xa0] sm:$0xff] }
  0xb4   :  { %527 = vmatprep.subr.mxu0 %v248_v37  ;;  %709 = vmatprep.subr.mxu1 %v616_v0  ;;  %v643_v37 = vld [vmem:[#allocation7 + $0x110] sm:$0xff]  ;;  %v762_v63 = vld [vmem:[#allocation8 + $0x20] sm:$0xff]  ;;  %v313_v0 = vlaneseq }
  0xb5   :  { %528 = vmatpush2.msra.mxu0 %v247_v38  ;;  %710 = vmatpush1.msra.mxu1 %v615_v1  ;;  %v642_v38 = vld [vmem:[#allocation7 + $0x108] sm:$0xff] }
  0xb6   :  { %530 = vmatmul.mubr.f32.vlgmr.msra.gmra.mxu0 %v84_v39  ;;  %711 = vmatprep.subr.mxu1 %v614_v2  ;;  %v641_v39 = vld [vmem:[#allocation7 + $0x100] sm:$0xff]  ;;  %v314_v1 = vshrl.u32 %v313_v0, 7 }
  0xb7   :  { %712 = vmatpush1.msra.mxu1 %v613_v3  ;;  %887 = vmatprep.subr.mxu0 %v789_v40  ;;  %v311_v3 = vld [vmem:[%s1116_s2] sm:$0x3] }
  0xb8   :  { %713 = vmatprep.subr.mxu1 %v612_v4  ;;  %888 = vmatpush3.msra.mxu0 %v773_v41  ;;  %v315_v2 = vsub.s32 0, %v314_v1  ;;  %v319_v4 = vsub.s32 1, %v314_v1 }
  0xb9   :  { %714 = vmatpush1.msra.mxu1 %v611_v5  ;;  %889 = vmatprep.subr.mxu0 %v788_v42 }
  0xba   :  { %715 = vmatprep.subr.mxu1 %v610_v6  ;;  %890 = vmatpush3.msra.mxu0 %v772_v43  ;;  %v316_v6 = vrot.slane %v311_v3, %v315_v2  ;;  %v886_v43 = vld [vmem:[%s1120_s6] ss:$0 sm:$0xff] }
  0xbb   :  { %716 = vmatpush1.msra.mxu1 %v609_v7  ;;  %891 = vmatprep.subr.mxu0 %v787_v44  ;;  %v320_v7 = vrot.slane %v311_v3, %v319_v4 }
  0xbc   :  { %717 = vmatprep.subr.mxu1 %v672_v8  ;;  %892 = vmatpush3.msra.mxu0 %v771_v45 }
  0xbd   :  { %718 = vmatpush2.msra.mxu1 %v671_v9  ;;  %893 = vmatprep.subr.mxu0 %v786_v46 }
  0xbe   :  { %719 = vmatprep.subr.mxu1 %v670_v10  ;;  %894 = vmatpush3.msra.mxu0 %v770_v47 }
  0xbf   :  { %720 = vmatpush2.msra.mxu1 %v669_v11  ;;  %895 = vmatprep.subr.mxu0 %v785_v48 }
  0xc0   :  { %721 = vmatprep.subr.mxu1 %v668_v12  ;;  %896 = vmatpush3.msra.mxu0 %v769_v49 }
  0xc1   :  { %722 = vmatpush2.msra.mxu1 %v667_v13  ;;  %897 = vmatprep.subr.mxu0 %v784_v50 }
  0xc2   :  { %723 = vmatprep.subr.mxu1 %v666_v14  ;;  %898 = vmatpush3.msra.mxu0 %v768_v51 }
  0xc3   :  { %724 = vmatpush2.msra.mxu1 %v665_v15  ;;  %899 = vmatprep.subr.mxu0 %v783_v52 }
  0xc4   :  { %725 = vmatprep.subr.mxu1 %v664_v16  ;;  %900 = vmatpush3.msra.mxu0 %v767_v53 }
  0xc5   :  { %726 = vmatpush2.msra.mxu1 %v663_v17  ;;  %901 = vmatprep.subr.mxu0 %v782_v54 }
  0xc6   :  { %727 = vmatprep.subr.mxu1 %v662_v18  ;;  %902 = vmatpush3.msra.mxu0 %v766_v55 }
  0xc7   :  { %728 = vmatpush2.msra.mxu1 %v661_v19  ;;  %903 = vmatprep.subr.mxu0 %v781_v56 }
  0xc8   :  { %729 = vmatprep.subr.mxu1 %v660_v20  ;;  %904 = vmatpush3.msra.mxu0 %v765_v57 }
  0xc9   :  { %730 = vmatpush2.msra.mxu1 %v659_v21  ;;  %905 = vmatprep.subr.mxu0 %v780_v58 }
  0xca   :  { %731 = vmatprep.subr.mxu1 %v658_v22  ;;  %906 = vmatpush3.msra.mxu0 %v764_v59 }
  0xcb   :  { %732 = vmatpush2.msra.mxu1 %v657_v23  ;;  %907 = vmatprep.subr.mxu0 %v779_v60 }
  0xcc   :  { %733 = vmatprep.subr.mxu1 %v656_v24  ;;  %908 = vmatpush3.msra.mxu0 %v763_v61 }
  0xcd   :  { %734 = vmatpush2.msra.mxu1 %v655_v25  ;;  %909 = vmatprep.subr.mxu0 %v778_v62  ;;  %v777_v25 = vld [vmem:[#allocation8 + $0x98] sm:$0xff] }
  0xce   :  { %735 = vmatprep.subr.mxu1 %v654_v26  ;;  %910 = vmatpush3.msra.mxu0 %v762_v63  ;;  %v761_v26 = vld [vmem:[#allocation8 + $0x18] sm:$0xff] }
  0xcf   :  { %736 = vmatpush2.msra.mxu1 %v653_v27  ;;  %911 = vmatprep.subr.mxu0 %v777_v25  ;;  %v776_v27 = vld [vmem:[#allocation8 + $0x90] sm:$0xff] }
  0xd0   :  { %737 = vmatprep.subr.mxu1 %v652_v28  ;;  %912 = vmatpush3.msra.mxu0 %v761_v26  ;;  %v760_v28 = vld [vmem:[#allocation8 + $0x10] sm:$0xff] }
  0xd1   :  { %738 = vmatpush2.msra.mxu1 %v651_v29  ;;  %913 = vmatprep.subr.mxu0 %v776_v27  ;;  %v775_v29 = vld [vmem:[#allocation8 + $0x88] sm:$0xff] }
  0xd2   :  { %739 = vmatprep.subr.mxu1 %v650_v30  ;;  %914 = vmatpush3.msra.mxu0 %v760_v28  ;;  %v759_v30 = vld [vmem:[#allocation8 + $0x8] sm:$0xff] }
  0xd3   :  { %740 = vmatpush2.msra.mxu1 %v649_v31  ;;  %915 = vmatprep.subr.mxu0 %v775_v29  ;;  %v774_v31 = vld [vmem:[#allocation8 + $0x80] sm:$0xff] }
  0xd4   :  { %741 = vmatprep.subr.mxu1 %v648_v32  ;;  %916 = vmatpush3.msra.mxu0 %v759_v30  ;;  %v758_v32 = vld [vmem:[#allocation8] sm:$0xff] }
  0xd5   :  { %742 = vmatpush2.msra.mxu1 %v647_v33  ;;  %917 = vmatprep.subr.mxu0 %v774_v31  ;;  %v673_v33 = vld [vmem:[%s1118_s4] sm:$0x3]  ;;  %s1012_s4 = scalar_lea.vmem %s876_s27, 128 }
  0xd6   :  { %743 = vmatprep.subr.mxu1 %v646_v34  ;;  %918 = vmatpush3.msra.mxu0 %v758_v32  ;;  %v678_v34 = vrot.slane %v673_v33, %v315_v2  ;;  %p1013_p6 = scmp.ne.s32.totalorder %s876_s27, %s1012_s4  ;;  %p1018_p8 = scmp.lt.s32.totalorder %s1012_s4, %s1012_s4 }
  0xd7   :  { %744 = vmatpush2.msra.mxu1 %v645_v35  ;;  %v682_v35 = vrot.slane %v673_v33, %v319_v4 }
  0xd8   :  { %745 = vmatprep.subr.mxu1 %v644_v36  ;;  %p1019_p9 = por %p1018_p8, %p1017_p7 }
  0xd9   :  { %746 = vmatpush2.msra.mxu1 %v643_v37 }
  0xda   :  { %747 = vmatprep.subr.mxu1 %v642_v38  ;;  %p1020_p10 = pnand %p1019_p9, %p1013_p6 }
  0xdb   :  { %748 = vmatpush2.msra.mxu1 %v641_v39 }
 0x135   :  { %v389_v5 = vpop.f32.mrf.mxu0 }
 0x136   :  { %v390_v10 = vadd.f32 %v389_v5, %v316_v6 }
 0x137   :  { %v391_v8 = vpop.f32.mrf.mxu0 }
 0x138   :  { %v460_v9 = vpop.f32.mrf.mxu1  ;;  %v392_v11 = vadd.f32 %v391_v8, %v320_v7 }
 0x139   :  { %v461_v13 = vadd.f32 %v460_v9, %v390_v10 }
 0x13a   :  { %v462_v12 = vpop.f32.mrf.mxu1 }
 0x13b   :  { %v463_v16 = vadd.f32 %v462_v12, %v392_v11 }
 0x15b   :  { %v602_v15 = vpop.f32.mrf.mxu1 }
 0x15d   :  { %v604_v21 = vpop.f32.mrf.mxu1 }
 0x176   :  { %v531_v14 = vpop.f32.mrf.mxu0 }
 0x177   :  { %v532_v17 = vadd.f32 %v531_v14, %v461_v13 }
 0x178   :  { %v533_v18 = vpop.f32.mrf.mxu0 }
 0x179   :  { %v534_v19 = vadd.f32 %v533_v18, %v463_v16  ;;  %v603_v20 = vadd.f32 %v602_v15, %v532_v17 }
 0x17b   :  { %v605_v22 = vadd.f32 %v604_v21, %v534_v19  ;;  %v607_v24 = vmax.f32 %v603_v20, 0.0 }
 0x17d   :  { %v608_v23 = vmax.f32 %v605_v22, 0.0 }
 0x17f   :  { %749 = vmatprep.mubr.f32.mxu1 %v608_v23 }
 0x180   :  { %750 = vmatmul.mubr.f32.vlgmr.msra.gmra.mxu1 %v607_v24 }
 0x240   :  { %v751_v36 = vpop.f32.mrf.mxu1 }
 0x241   :  { %v752_v37 = vadd.f32 %v751_v36, %v678_v34 }
 0x242   :  { %v753_v38 = vpop.f32.mrf.mxu1 }
 0x243   :  { %v754_v39 = vadd.f32 %v753_v38, %v682_v35  ;;  %v756_v41 = vmax.f32 %v752_v37, 0.0 }
 0x245   :  { %v757_v40 = vmax.f32 %v754_v39, 0.0 }
 0x247   :  { %861 = vmatprep.mubr.f32.mxu0 %v757_v40 }
 0x248   :  { %862 = vmatmul.mubr.f32.vlgmr.msra.gmra.mxu0 %v756_v41 }
 0x308   :  { %v919_v42 = vpop.f32.mrf.mxu0 }
 0x30a   :  { %v920_v44 = vpop.f32.mrf.mxu0 }
 0x30b   :  { %v921_v45 = vadd.f32 %v920_v44, %v919_v42 }
 0x30d   :  { %v864_v46 = vadd.f32 %v921_v45, %v886_v43 }
 0x30f   :  { %v867_v47 = vmax.f32 %v864_v46, 0.0 }
 0x311   :  { %868 = vst [vmem:[#allocation10] sm:$0xff] %v867_v47 }
 0x312   :  { %1023 = shalt.err (!%p1020_p10)
}
 0x313   :  { %878 = dma.vmem_to_hbm [thread:$0]  %s876_s27, 128, %s1121_s7, [#allocation4]  }
 0x314   :  { %1038 = dma.done.wait [#allocation4], 128  }
 0x315   :  { %1039 = vsyncadd [#allocation4], 4294967168 }
 0x316   :  { %882 = vsyncpa [#allocation3], 1 }
 0x317   :  { %883 = vsyncpa [#allocation6], 1 }
 0x318   :  { %884 = vsyncpa [#allocation9], 1 }
 0x319   :  { %885 = vsyncpa [#allocation4], 1 }

</bundles_post_ra>
